<compile_context>
chip_gen: v6e
topology: v6e:2x2x1
jax: 0.10.0
libtpu: 0.0.40
codegen_flags: <defaults>
</compile_context>

<pallas_src>
import jax
import jax.numpy as jnp
from jax.experimental import pallas as pl
from jax.experimental.pallas import tpu as pltpu

_LEAK = 0.2
_BN_EPS = 1e-5


# ---------------------------------------------------------------------------
# Kernel bodies (single full-array VMEM block each)
# ---------------------------------------------------------------------------
def _leaky_relu(x):
    return jnp.where(x > 0, x, _LEAK * x)


def _batchnorm(x, gamma, beta):
    # Training-mode batch statistics (biased variance) — matches the PyTorch
    # module's default train() forward.
    mean = jnp.mean(x, axis=1, keepdims=True)
    d = x - mean
    var = jnp.mean(d * d, axis=1, keepdims=True)
    return d * jax.lax.rsqrt(var + _BN_EPS) * gamma + beta


def _conv_lrelu_kernel(w_ref, p_ref, o_ref):
    # w: (Cout, K) bf16, p: (K, M) bf16 -> o: (Cout, M) f32, lane-dense
    acc = jnp.dot(w_ref[...], p_ref[...], preferred_element_type=jnp.float32)
    o_ref[...] = _leaky_relu(acc)


def _conv_bn_lrelu_kernel(w_ref, p_ref, g_ref, b_ref, o_ref):
    acc = jnp.dot(w_ref[...], p_ref[...], preferred_element_type=jnp.float32)
    o_ref[...] = _leaky_relu(_batchnorm(acc, g_ref[...], b_ref[...]))


def _conv_bn_lrelu_head_kernel(w_ref, p_ref, g_ref, b_ref, w4_ref, gsel_ref, o_ref):
    acc = jnp.dot(w_ref[...], p_ref[...], preferred_element_type=jnp.float32)
    h = _leaky_relu(_batchnorm(acc, g_ref[...], b_ref[...]))      # (C3, N*16)
    # Final Conv2d(C3, 1, k=4, s=1, p=0) on the 4x4 map == per-sample full
    # reduction: elementwise weight, sublane-reduce, then group lanes by sample
    # via a tiny 0/1 selection matmul -> (1, N).
    s = jnp.sum(h * w4_ref[...], axis=0, keepdims=True)           # (1, N*16)
    o_ref[...] = jnp.dot(s, gsel_ref[...], preferred_element_type=jnp.float32)


# ---------------------------------------------------------------------------
# pallas_call wrapper: one grid step, full-array blocks (everything fits VMEM)
# ---------------------------------------------------------------------------
def _full_call(kernel, out_shape, inputs):
    return pl.pallas_call(
        kernel,
        out_shape=out_shape,
        grid=(1,),
        in_specs=[pl.BlockSpec(x.shape, lambda i: (0, 0)) for x in inputs],
        out_specs=pl.BlockSpec(out_shape.shape, lambda i: (0, 0)),
        compiler_params=pltpu.CompilerParams(dimension_semantics=("arbitrary",)),
    )(*inputs)


# ---------------------------------------------------------------------------
# XLA-side glue: im2col on channel-major (C, N, H, W) activations
# ---------------------------------------------------------------------------
def _im2col_cnhw(x_cnhw, ksize=4, stride=2, pad=1):
    # Returns patches (C*kh*kw, N*Ho*Wo); K ordering = c*16 + (i*4 + j), which
    # matches weight.reshape(Cout, Cin*16). No transposes anywhere.
    C, N, H, W = x_cnhw.shape
    xp = jnp.pad(x_cnhw, ((0, 0), (0, 0), (pad, pad), (pad, pad)))
    Ho = (H + 2 * pad - ksize) // stride + 1
    Wo = (W + 2 * pad - ksize) // stride + 1
    taps = []
    for i in range(ksize):
        for j in range(ksize):
            taps.append(xp[:, :, i:i + stride * Ho:stride, j:j + stride * Wo:stride])
    patches = jnp.stack(taps, axis=1).reshape(C * ksize * ksize, N * Ho * Wo)
    return patches, Ho, Wo


# ---------------------------------------------------------------------------
# Forward pass (= DCDiscriminator.forward, training-mode BN)
# ---------------------------------------------------------------------------
def dcdiscriminator_forward(params, x):
    # x: (N, 3, 32, 32) NCHW (PyTorch convention)
    N = x.shape[0]
    xc = jnp.transpose(x, (1, 0, 2, 3))                           # (3, N, H, W)

    def as_mat(w):  # (Cout, Cin, 4, 4) -> (Cout, Cin*16) bf16 MXU operand
        return w.reshape(w.shape[0], -1).astype(jnp.bfloat16)

    # ---- layer 1: Conv(3 -> ndf*2, 4, 2, 1, bias=False) + LeakyReLU(0.2) ----
    p1, H1, W1 = _im2col_cnhw(xc)
    w1m = as_mat(params["w1"])
    C1 = w1m.shape[0]
    h1 = _full_call(
        _conv_lrelu_kernel,
        jax.ShapeDtypeStruct((C1, p1.shape[1]), jnp.float32),
        [w1m, p1.astype(jnp.bfloat16)],
    ).reshape(C1, N, H1, W1)

    # ---- layer 2: Conv(ndf*2 -> ndf*4) + BatchNorm + LeakyReLU --------------
    p2, H2, W2 = _im2col_cnhw(h1)
    w2m = as_mat(params["w2"])
    C2 = w2m.shape[0]
    h2 = _full_call(
        _conv_bn_lrelu_kernel,
        jax.ShapeDtypeStruct((C2, p2.shape[1]), jnp.float32),
        [w2m, p2.astype(jnp.bfloat16),
         params["g2"].reshape(C2, 1), params["b2"].reshape(C2, 1)],
    ).reshape(C2, N, H2, W2)

    # ---- layer 3: Conv(ndf*4 -> ndf*8) + BN + LeakyReLU + Conv(ndf*8 -> 1) --
    p3, H3, W3 = _im2col_cnhw(h2)
    assert H3 == 4 and W3 == 4, "final 4x4 valid conv expects a 4x4 feature map"
    w3m = as_mat(params["w3"])
    C3 = w3m.shape[0]
    M3 = p3.shape[1]                                              # N * 16
    S = H3 * W3
    w4_tiled = jnp.tile(params["w4"].reshape(C3, S), (1, N))      # (C3, M3)
    gsel = (jnp.arange(M3)[:, None] // S ==
            jnp.arange(N)[None, :]).astype(jnp.float32)           # (M3, N)
    out = _full_call(
        _conv_bn_lrelu_head_kernel,
        jax.ShapeDtypeStruct((1, N), jnp.float32),
        [w3m, p3.astype(jnp.bfloat16),
         params["g3"].reshape(C3, 1), params["b3"].reshape(C3, 1),
         w4_tiled, gsel],
    )
    return out.reshape(N)                                         # view(-1,1).squeeze(1)


# ---------------------------------------------------------------------------
# Parameter init (bias=False convs; BN gamma=1, beta=0 as in PyTorch defaults)
# ---------------------------------------------------------------------------
def init_params(key, ndf):
    k1, k2, k3, k4 = jax.random.split(key, 4)

    def conv_w(k, cout, cin):
        return 0.02 * jax.random.normal(k, (cout, cin, 4, 4), jnp.float32)

    return {
        "w1": conv_w(k1, ndf * 2, 3),
        "w2": conv_w(k2, ndf * 4, ndf * 2),
        "g2": jnp.ones((ndf * 4,), jnp.float32),
        "b2": jnp.zeros((ndf * 4,), jnp.float32),
        "w3": conv_w(k3, ndf * 8, ndf * 4),
        "g3": jnp.ones((ndf * 8,), jnp.float32),
        "b3": jnp.zeros((ndf * 8,), jnp.float32),
        "w4": conv_w(k4, 1, ndf * 8),
    }


if __name__ == "__main__":
    ndf = 8
    batch = 2
    key = jax.random.PRNGKey(0)
    kx, kp = jax.random.split(key)

    # Three stride-2 convs: 32 -> 16 -> 8 -> 4, then the 4x4 valid conv -> 1x1.
    x = jax.random.normal(kx, (batch, 3, 32, 32), jnp.float32)
    params = init_params(kp, ndf)

    fwd = jax.jit(dcdiscriminator_forward)
    out = jax.block_until_ready(fwd(params, x))
    assert out.shape == (batch,) and out.dtype == jnp.float32
    print("KERNEL_OK")
</pallas_src>

<mosaic_0001>
module attributes {stable_mosaic.version = 11 : i64} {
  func.func @_conv_lrelu_kernel(%arg0: i32, %arg1: memref<16x48xbf16, #tpu.memory_space<vmem>>, %arg2: memref<48x512xbf16, #tpu.memory_space<vmem>>, %arg3: memref<16x512xf32, #tpu.memory_space<vmem>>) attributes {dimension_semantics = [#tpu.dimension_semantics<arbitrary>], iteration_bounds = array<i64: 1>, scalar_prefetch = 0 : i64, scratch_operands = 0 : i64, tpu.core_type = #tpu.core_type<tc>, window_params = [{pipeline_mode = #tpu.pipeline_mode<synchronous>, transform_indices = @transform_0, window_bounds = array<i64: 16, 48>}, {pipeline_mode = #tpu.pipeline_mode<synchronous>, transform_indices = @transform_1, window_bounds = array<i64: 48, 512>}, {pipeline_mode = #tpu.pipeline_mode<synchronous>, transform_indices = @transform_2, window_bounds = array<i64: 16, 512>}]} {
    %c0 = arith.constant 0 : index
    %c0_0 = arith.constant 0 : index
    %0 = vector.load %arg1[%c0, %c0_0] : memref<16x48xbf16, #tpu.memory_space<vmem>>, vector<16x48xbf16>
    %c0_1 = arith.constant 0 : index
    %c0_2 = arith.constant 0 : index
    %1 = vector.load %arg2[%c0_1, %c0_2] : memref<48x512xbf16, #tpu.memory_space<vmem>>, vector<48x512xbf16>
    %cst = arith.constant dense<0.000000e+00> : vector<16x512xf32>
    %2 = tpu.matmul %0, %1, %cst {dimension_numbers = #tpu.dot_dimension_numbers<[1], [0], [0], [1], [0, 0, 1, 1], [], []>} : vector<16x48xbf16>, vector<48x512xbf16>, vector<16x512xf32> -> vector<16x512xf32>
    %cst_3 = arith.constant 0.000000e+00 : f32
    %3 = vector.broadcast %cst_3 : f32 to vector<16x512xf32>
    %4 = arith.cmpf ogt, %2, %3 : vector<16x512xf32>
    %cst_4 = arith.constant 2.000000e-01 : f32
    %5 = vector.broadcast %cst_4 : f32 to vector<16x512xf32>
    %6 = arith.mulf %5, %2 : vector<16x512xf32>
    %7 = arith.select %4, %2, %6 : vector<16x512xi1>, vector<16x512xf32>
    %c0_5 = arith.constant 0 : index
    %c0_6 = arith.constant 0 : index
    %8 = vector.load %arg3[%c0_5, %c0_6] : memref<16x512xf32, #tpu.memory_space<vmem>>, vector<16x512xf32>
    tpu.vector_store %arg3[%c0_5, %c0_6], %7 {strides = array<i32>} : memref<16x512xf32, #tpu.memory_space<vmem>>, vector<16x512xf32>,
    return
  }
  func.func @transform_0(%arg0: i32) -> (i32, i32) {
    %c0_i32 = arith.constant 0 : i32
    %c0_i32_0 = arith.constant 0 : i32
    %c0_i32_1 = arith.constant 0 : i32
    return %c0_i32, %c0_i32_0 : i32, i32
  }
  func.func @transform_1(%arg0: i32) -> (i32, i32) {
    %c0_i32 = arith.constant 0 : i32
    %c0_i32_0 = arith.constant 0 : i32
    %c0_i32_1 = arith.constant 0 : i32
    return %c0_i32, %c0_i32_0 : i32, i32
  }
  func.func @transform_2(%arg0: i32) -> (i32, i32) {
    %c0_i32 = arith.constant 0 : i32
    %c0_i32_0 = arith.constant 0 : i32
    %c0_i32_1 = arith.constant 0 : i32
    return %c0_i32, %c0_i32_0 : i32, i32
  }
}

module attributes {stable_mosaic.version = 11 : i64} {
  func.func @_conv_bn_lrelu_kernel(%arg0: i32, %arg1: memref<32x256xbf16, #tpu.memory_space<vmem>>, %arg2: memref<256x128xbf16, #tpu.memory_space<vmem>>, %arg3: memref<32x1xf32, #tpu.memory_space<vmem>>, %arg4: memref<32x1xf32, #tpu.memory_space<vmem>>, %arg5: memref<32x128xf32, #tpu.memory_space<vmem>>) attributes {dimension_semantics = [#tpu.dimension_semantics<arbitrary>], iteration_bounds = array<i64: 1>, scalar_prefetch = 0 : i64, scratch_operands = 0 : i64, tpu.core_type = #tpu.core_type<tc>, window_params = [{pipeline_mode = #tpu.pipeline_mode<synchronous>, transform_indices = @transform_0, window_bounds = array<i64: 32, 256>}, {pipeline_mode = #tpu.pipeline_mode<synchronous>, transform_indices = @transform_1, window_bounds = array<i64: 256, 128>}, {pipeline_mode = #tpu.pipeline_mode<synchronous>, transform_indices = @transform_2, window_bounds = array<i64: 32, 1>}, {pipeline_mode = #tpu.pipeline_mode<synchronous>, transform_indices = @transform_3, window_bounds = array<i64: 32, 1>}, {pipeline_mode = #tpu.pipeline_mode<synchronous>, transform_indices = @transform_4, window_bounds = array<i64: 32, 128>}]} {
    %c0 = arith.constant 0 : index
    %c0_0 = arith.constant 0 : index
    %0 = vector.load %arg1[%c0, %c0_0] : memref<32x256xbf16, #tpu.memory_space<vmem>>, vector<32x256xbf16>
    %c0_1 = arith.constant 0 : index
    %c0_2 = arith.constant 0 : index
    %1 = vector.load %arg2[%c0_1, %c0_2] : memref<256x128xbf16, #tpu.memory_space<vmem>>, vector<256x128xbf16>
    %cst = arith.constant dense<0.000000e+00> : vector<32x128xf32>
    %2 = tpu.matmul %0, %1, %cst {dimension_numbers = #tpu.dot_dimension_numbers<[1], [0], [0], [1], [0, 0, 1, 1], [], []>} : vector<32x256xbf16>, vector<256x128xbf16>, vector<32x128xf32> -> vector<32x128xf32>
    %c0_3 = arith.constant 0 : index
    %c0_4 = arith.constant 0 : index
    %3 = vector.load %arg3[%c0_3, %c0_4] : memref<32x1xf32, #tpu.memory_space<vmem>>, vector<32x1xf32>
    %c0_5 = arith.constant 0 : index
    %c0_6 = arith.constant 0 : index
    %4 = vector.load %arg4[%c0_5, %c0_6] : memref<32x1xf32, #tpu.memory_space<vmem>>, vector<32x1xf32>
    %cst_7 = arith.constant dense<0.000000e+00> : vector<32xf32>
    %5 = vector.multi_reduction <add>, %2, %cst_7 [1] : vector<32x128xf32> to vector<32xf32>
    %6 = vector.shape_cast %5 : vector<32xf32> to vector<32x1xf32>
    %cst_8 = arith.constant 1.280000e+02 : f32
    %7 = vector.broadcast %cst_8 : f32 to vector<32x1xf32>
    %8 = arith.divf %6, %7 : vector<32x1xf32>
    %9 = vector.broadcast %8 : vector<32x1xf32> to vector<32x128xf32>
    %10 = arith.subf %2, %9 : vector<32x128xf32>
    %11 = arith.mulf %10, %10 : vector<32x128xf32>
    %cst_9 = arith.constant dense<0.000000e+00> : vector<32xf32>
    %12 = vector.multi_reduction <add>, %11, %cst_9 [1] : vector<32x128xf32> to vector<32xf32>
    %13 = vector.shape_cast %12 : vector<32xf32> to vector<32x1xf32>
    %cst_10 = arith.constant 1.280000e+02 : f32
    %14 = vector.broadcast %cst_10 : f32 to vector<32x1xf32>
    %15 = arith.divf %13, %14 : vector<32x1xf32>
    %cst_11 = arith.constant 9.99999974E-6 : f32
    %16 = vector.broadcast %cst_11 : f32 to vector<32x1xf32>
    %17 = arith.addf %15, %16 : vector<32x1xf32>
    %18 = math.rsqrt %17 : vector<32x1xf32>
    %19 = vector.broadcast %18 : vector<32x1xf32> to vector<32x128xf32>
    %20 = arith.mulf %10, %19 : vector<32x128xf32>
    %21 = vector.broadcast %3 : vector<32x1xf32> to vector<32x128xf32>
    %22 = arith.mulf %20, %21 : vector<32x128xf32>
    %23 = vector.broadcast %4 : vector<32x1xf32> to vector<32x128xf32>
    %24 = arith.addf %22, %23 : vector<32x128xf32>
    %cst_12 = arith.constant 0.000000e+00 : f32
    %25 = vector.broadcast %cst_12 : f32 to vector<32x128xf32>
    %26 = arith.cmpf ogt, %24, %25 : vector<32x128xf32>
    %cst_13 = arith.constant 2.000000e-01 : f32
    %27 = vector.broadcast %cst_13 : f32 to vector<32x128xf32>
    %28 = arith.mulf %27, %24 : vector<32x128xf32>
    %29 = arith.select %26, %24, %28 : vector<32x128xi1>, vector<32x128xf32>
    %c0_14 = arith.constant 0 : index
    %c0_15 = arith.constant 0 : index
    %30 = vector.load %arg5[%c0_14, %c0_15] : memref<32x128xf32, #tpu.memory_space<vmem>>, vector<32x128xf32>
    tpu.vector_store %arg5[%c0_14, %c0_15], %29 {strides = array<i32>} : memref<32x128xf32, #tpu.memory_space<vmem>>, vector<32x128xf32>,
    return
  }
  func.func @transform_0(%arg0: i32) -> (i32, i32) {
    %c0_i32 = arith.constant 0 : i32
    %c0_i32_0 = arith.constant 0 : i32
    %c0_i32_1 = arith.constant 0 : i32
    return %c0_i32, %c0_i32_0 : i32, i32
  }
  func.func @transform_1(%arg0: i32) -> (i32, i32) {
    %c0_i32 = arith.constant 0 : i32
    %c0_i32_0 = arith.constant 0 : i32
    %c0_i32_1 = arith.constant 0 : i32
    return %c0_i32, %c0_i32_0 : i32, i32
  }
  func.func @transform_2(%arg0: i32) -> (i32, i32) {
    %c0_i32 = arith.constant 0 : i32
    %c0_i32_0 = arith.constant 0 : i32
    %c0_i32_1 = arith.constant 0 : i32
    return %c0_i32, %c0_i32_0 : i32, i32
  }
  func.func @transform_3(%arg0: i32) -> (i32, i32) {
    %c0_i32 = arith.constant 0 : i32
    %c0_i32_0 = arith.constant 0 : i32
    %c0_i32_1 = arith.constant 0 : i32
    return %c0_i32, %c0_i32_0 : i32, i32
  }
  func.func @transform_4(%arg0: i32) -> (i32, i32) {
    %c0_i32 = arith.constant 0 : i32
    %c0_i32_0 = arith.constant 0 : i32
    %c0_i32_1 = arith.constant 0 : i32
    return %c0_i32, %c0_i32_0 : i32, i32
  }
}

module attributes {stable_mosaic.version = 11 : i64} {
  func.func @_conv_bn_lrelu_head_kernel(%arg0: i32, %arg1: memref<64x512xbf16, #tpu.memory_space<vmem>>, %arg2: memref<512x32xbf16, #tpu.memory_space<vmem>>, %arg3: memref<64x1xf32, #tpu.memory_space<vmem>>, %arg4: memref<64x1xf32, #tpu.memory_space<vmem>>, %arg5: memref<64x32xf32, #tpu.memory_space<vmem>>, %arg6: memref<32x2xf32, #tpu.memory_space<vmem>>, %arg7: memref<1x2xf32, #tpu.memory_space<vmem>>) attributes {dimension_semantics = [#tpu.dimension_semantics<arbitrary>], iteration_bounds = array<i64: 1>, scalar_prefetch = 0 : i64, scratch_operands = 0 : i64, tpu.core_type = #tpu.core_type<tc>, window_params = [{pipeline_mode = #tpu.pipeline_mode<synchronous>, transform_indices = @transform_0, window_bounds = array<i64: 64, 512>}, {pipeline_mode = #tpu.pipeline_mode<synchronous>, transform_indices = @transform_1, window_bounds = array<i64: 512, 32>}, {pipeline_mode = #tpu.pipeline_mode<synchronous>, transform_indices = @transform_2, window_bounds = array<i64: 64, 1>}, {pipeline_mode = #tpu.pipeline_mode<synchronous>, transform_indices = @transform_3, window_bounds = array<i64: 64, 1>}, {pipeline_mode = #tpu.pipeline_mode<synchronous>, transform_indices = @transform_4, window_bounds = array<i64: 64, 32>}, {pipeline_mode = #tpu.pipeline_mode<synchronous>, transform_indices = @transform_5, window_bounds = array<i64: 32, 2>}, {pipeline_mode = #tpu.pipeline_mode<synchronous>, transform_indices = @transform_6, window_bounds = array<i64: 1, 2>}]} {
    %c0 = arith.constant 0 : index
    %c0_0 = arith.constant 0 : index
    %0 = vector.load %arg1[%c0, %c0_0] : memref<64x512xbf16, #tpu.memory_space<vmem>>, vector<64x512xbf16>
    %c0_1 = arith.constant 0 : index
    %c0_2 = arith.constant 0 : index
    %1 = vector.load %arg2[%c0_1, %c0_2] : memref<512x32xbf16, #tpu.memory_space<vmem>>, vector<512x32xbf16>
    %cst = arith.constant dense<0.000000e+00> : vector<64x32xf32>
    %2 = tpu.matmul %0, %1, %cst {dimension_numbers = #tpu.dot_dimension_numbers<[1], [0], [0], [1], [0, 0, 1, 1], [], []>} : vector<64x512xbf16>, vector<512x32xbf16>, vector<64x32xf32> -> vector<64x32xf32>
    %c0_3 = arith.constant 0 : index
    %c0_4 = arith.constant 0 : index
    %3 = vector.load %arg3[%c0_3, %c0_4] : memref<64x1xf32, #tpu.memory_space<vmem>>, vector<64x1xf32>
    %c0_5 = arith.constant 0 : index
    %c0_6 = arith.constant 0 : index
    %4 = vector.load %arg4[%c0_5, %c0_6] : memref<64x1xf32, #tpu.memory_space<vmem>>, vector<64x1xf32>
    %cst_7 = arith.constant dense<0.000000e+00> : vector<64xf32>
    %5 = vector.multi_reduction <add>, %2, %cst_7 [1] : vector<64x32xf32> to vector<64xf32>
    %6 = vector.shape_cast %5 : vector<64xf32> to vector<64x1xf32>
    %cst_8 = arith.constant 3.200000e+01 : f32
    %7 = vector.broadcast %cst_8 : f32 to vector<64x1xf32>
    %8 = arith.divf %6, %7 : vector<64x1xf32>
    %9 = vector.broadcast %8 : vector<64x1xf32> to vector<64x32xf32>
    %10 = arith.subf %2, %9 : vector<64x32xf32>
    %11 = arith.mulf %10, %10 : vector<64x32xf32>
    %cst_9 = arith.constant dense<0.000000e+00> : vector<64xf32>
    %12 = vector.multi_reduction <add>, %11, %cst_9 [1] : vector<64x32xf32> to vector<64xf32>
    %13 = vector.shape_cast %12 : vector<64xf32> to vector<64x1xf32>
    %cst_10 = arith.constant 3.200000e+01 : f32
    %14 = vector.broadcast %cst_10 : f32 to vector<64x1xf32>
    %15 = arith.divf %13, %14 : vector<64x1xf32>
    %cst_11 = arith.constant 9.99999974E-6 : f32
    %16 = vector.broadcast %cst_11 : f32 to vector<64x1xf32>
    %17 = arith.addf %15, %16 : vector<64x1xf32>
    %18 = math.rsqrt %17 : vector<64x1xf32>
    %19 = vector.broadcast %18 : vector<64x1xf32> to vector<64x32xf32>
    %20 = arith.mulf %10, %19 : vector<64x32xf32>
    %21 = vector.broadcast %3 : vector<64x1xf32> to vector<64x32xf32>
    %22 = arith.mulf %20, %21 : vector<64x32xf32>
    %23 = vector.broadcast %4 : vector<64x1xf32> to vector<64x32xf32>
    %24 = arith.addf %22, %23 : vector<64x32xf32>
    %cst_12 = arith.constant 0.000000e+00 : f32
    %25 = vector.broadcast %cst_12 : f32 to vector<64x32xf32>
    %26 = arith.cmpf ogt, %24, %25 : vector<64x32xf32>
    %cst_13 = arith.constant 2.000000e-01 : f32
    %27 = vector.broadcast %cst_13 : f32 to vector<64x32xf32>
    %28 = arith.mulf %27, %24 : vector<64x32xf32>
    %29 = arith.select %26, %24, %28 : vector<64x32xi1>, vector<64x32xf32>
    %c0_14 = arith.constant 0 : index
    %c0_15 = arith.constant 0 : index
    %30 = vector.load %arg5[%c0_14, %c0_15] : memref<64x32xf32, #tpu.memory_space<vmem>>, vector<64x32xf32>
    %31 = arith.mulf %29, %30 : vector<64x32xf32>
    %cst_16 = arith.constant dense<0.000000e+00> : vector<32xf32>
    %32 = vector.multi_reduction <add>, %31, %cst_16 [0] : vector<64x32xf32> to vector<32xf32>
    %33 = vector.shape_cast %32 : vector<32xf32> to vector<1x32xf32>
    %c0_17 = arith.constant 0 : index
    %c0_18 = arith.constant 0 : index
    %34 = vector.load %arg6[%c0_17, %c0_18] : memref<32x2xf32, #tpu.memory_space<vmem>>, vector<32x2xf32>
    %cst_19 = arith.constant dense<0.000000e+00> : vector<1x2xf32>
    %35 = tpu.matmul %33, %34, %cst_19 {dimension_numbers = #tpu.dot_dimension_numbers<[1], [0], [0], [1], [0, 0, 1, 1], [], []>} : vector<1x32xf32>, vector<32x2xf32>, vector<1x2xf32> -> vector<1x2xf32>
    %c0_20 = arith.constant 0 : index
    %c0_21 = arith.constant 0 : index
    %36 = vector.load %arg7[%c0_20, %c0_21] : memref<1x2xf32, #tpu.memory_space<vmem>>, vector<1x2xf32>
    tpu.vector_store %arg7[%c0_20, %c0_21], %35 {strides = array<i32>} : memref<1x2xf32, #tpu.memory_space<vmem>>, vector<1x2xf32>,
    return
  }
  func.func @transform_0(%arg0: i32) -> (i32, i32) {
    %c0_i32 = arith.constant 0 : i32
    %c0_i32_0 = arith.constant 0 : i32
    %c0_i32_1 = arith.constant 0 : i32
    return %c0_i32, %c0_i32_0 : i32, i32
  }
  func.func @transform_1(%arg0: i32) -> (i32, i32) {
    %c0_i32 = arith.constant 0 : i32
    %c0_i32_0 = arith.constant 0 : i32
    %c0_i32_1 = arith.constant 0 : i32
    return %c0_i32, %c0_i32_0 : i32, i32
  }
  func.func @transform_2(%arg0: i32) -> (i32, i32) {
    %c0_i32 = arith.constant 0 : i32
    %c0_i32_0 = arith.constant 0 : i32
    %c0_i32_1 = arith.constant 0 : i32
    return %c0_i32, %c0_i32_0 : i32, i32
  }
  func.func @transform_3(%arg0: i32) -> (i32, i32) {
    %c0_i32 = arith.constant 0 : i32
    %c0_i32_0 = arith.constant 0 : i32
    %c0_i32_1 = arith.constant 0 : i32
    return %c0_i32, %c0_i32_0 : i32, i32
  }
  func.func @transform_4(%arg0: i32) -> (i32, i32) {
    %c0_i32 = arith.constant 0 : i32
    %c0_i32_0 = arith.constant 0 : i32
    %c0_i32_1 = arith.constant 0 : i32
    return %c0_i32, %c0_i32_0 : i32, i32
  }
  func.func @transform_5(%arg0: i32) -> (i32, i32) {
    %c0_i32 = arith.constant 0 : i32
    %c0_i32_0 = arith.constant 0 : i32
    %c0_i32_1 = arith.constant 0 : i32
    return %c0_i32, %c0_i32_0 : i32, i32
  }
  func.func @transform_6(%arg0: i32) -> (i32, i32) {
    %c0_i32 = arith.constant 0 : i32
    %c0_i32_0 = arith.constant 0 : i32
    %c0_i32_1 = arith.constant 0 : i32
    return %c0_i32, %c0_i32_0 : i32, i32
  }
}

</mosaic_0001>

<bundles_post_ra>
// kernel: dcdiscriminator_forward.3
= control target key start
LH: loop header
LB: loop body
LE: loop exit
PB: predicated region body
PF: predicated region fallthrough
CT: control target
= control target key end

     0   :  { %v252_v1 = vmov 0   ;;  %vm91_vm0 = vcmask 392192   ;;  %s331_s1 = inlined_call_operand.vmem [shape: bf16[48,512], index: 1, kind: input, shape index: {}]   ;;  %s332_s0 = inlined_call_operand.vmem [shape: bf16[16,48], index: 0, kind: input, shape index: {}]   ;;  %s333_s2 = inlined_call_operand.vmem [shape: f32[16,512], index: 2, kind: output, shape index: {}]  }
   0x1   :  { %v233_v0 = vld [vmem:[%s331_s1 + $0x44] ss:$16 sps:$4 sm:$0xff]   ;;  %127 = vmatprep.mubr.bf16.mxu0 %v252_v1  ;;  %170 = vmatprep.mubr.bf16.mxu1 %v252_v1  ;;  %v235_v2 = vld [vmem:[%s331_s1 + $0x4c] ss:$16 sps:$4 sm:$0xff]   ;;  %v237_v3 = vld [vmem:[%s331_s1 + $0x40] ss:$16 sps:$4 sm:$0xff]  }
   0x2   :  { %105 = vmatprep.subr.bf16.mxu0 %v233_v0  ;;  %v238_v4 = vld [vmem:[%s331_s1 + $0x48] ss:$16 sps:$4 sm:$0xff]   ;;  %148 = vmatprep.subr.bf16.mxu1 %v235_v2  ;;  %v239_v5 = vld [vmem:[%s331_s1 + $0x24] ss:$16 sps:$4 sm:$0xff]   ;;  %v241_v6 = vld [vmem:[%s331_s1 + $0x2c] ss:$16 sps:$4 sm:$0xff]  }
   0x3   :  { %106 = vmatpush1.bf16.msra.mxu0 %v237_v3  ;;  %149 = vmatpush1.bf16.msra.mxu1 %v238_v4  ;;  %v243_v7 = vld [vmem:[%s331_s1 + $0x20] ss:$16 sps:$4 sm:$0xff]   ;;  %v244_v8 = vld [vmem:[%s331_s1 + $0x28] ss:$16 sps:$4 sm:$0xff]   ;;  %v245_v9 = vld [vmem:[%s331_s1 + $0x4] ss:$16 sps:$4 sm:$0xff]  }
   0x4   :  { %107 = vmatprep.subr.bf16.mxu0 %v239_v5  ;;  %150 = vmatprep.subr.bf16.mxu1 %v241_v6  ;;  %v247_v10 = vld [vmem:[%s331_s1 + $0xc] ss:$16 sps:$4 sm:$0xff]   ;;  %v249_v11 = vld [vmem:[%s331_s1] ss:$16 sps:$4 sm:$0xff]   ;;  %v250_v12 = vld [vmem:[%s331_s1 + $0x8] ss:$16 sps:$4 sm:$0xff]  }
   0x5   :  { %v251_v13 = vld [vmem:[%s332_s0] sm:$0xff]  }
   0x7   :  { %108 = vmatpush1.bf16.msra.mxu0 %v243_v7  ;;  %151 = vmatpush1.bf16.msra.mxu1 %v244_v8 }
   0x8   :  { %109 = vmatprep.subr.bf16.mxu0 %v245_v9  ;;  %152 = vmatprep.subr.bf16.mxu1 %v247_v10 }
   0xb   :  { %110 = vmatpush1.bf16.msra.mxu0 %v249_v11  ;;  %153 = vmatpush1.bf16.msra.mxu1 %v250_v12 }
   0xe   :  { %230 = vmatmul.mubr.msk.bf16.vlgmr.msra.gmra.mxu0 %vm91_vm0, %v251_v13  ;;  %231 = vmatmul.mubr.msk.bf16.vlgmr.msra.gmra.mxu1 %vm91_vm0, %v251_v13 }
  0xce   :  { %v129_v14 = vpop.f32.mrf.mxu0  ;;  %v172_v15 = vpop.f32.mrf.mxu1 }
  0xcf   :  { %vm181_vm1 = vcmp.gt.f32.partialorder %v129_v14, 0.0  ;;  %v189_v16 = vmul.f32 0.2, %v129_v14  ;;  %vm183_vm2 = vcmp.gt.f32.partialorder %v172_v15, 0.0  ;;  %v191_v17 = vmul.f32 0.2, %v172_v15 }
  0xd0   :  { %v131_v18 = vpop.f32.mrf.mxu0  ;;  %v174_v19 = vpop.f32.mrf.mxu1 }
  0xd1   :  { %v197_v20 = vsel %vm181_vm1, %v129_v14, %v189_v16  ;;  %v199_v21 = vsel %vm183_vm2, %v172_v15, %v191_v17  ;;  %vm182_vm3 = vcmp.gt.f32.partialorder %v131_v18, 0.0  ;;  %v190_v22 = vmul.f32 0.2, %v131_v18 }
  0xd2   :  { %205 = vst [vmem:[%s333_s2] sm:$0xff] %v197_v20  ;;  %207 = vst [vmem:[%s333_s2 + $0x10] sm:$0xff] %v199_v21  ;;  %vm184_vm4 = vcmp.gt.f32.partialorder %v174_v19, 0.0  ;;  %v192_v23 = vmul.f32 0.2, %v174_v19  ;;  %v133_v24 = vpop.f32.mrf.mxu0  ;;  %v176_v25 = vpop.f32.mrf.mxu1 }
  0xd3   :  { %v198_v26 = vsel %vm182_vm3, %v131_v18, %v190_v22  ;;  %vm185_vm5 = vcmp.gt.f32.partialorder %v133_v24, 0.0  ;;  %v193_v27 = vmul.f32 0.2, %v133_v24  ;;  %vm187_vm6 = vcmp.gt.f32.partialorder %v176_v25, 0.0 }
  0xd4   :  { %206 = vst [vmem:[%s333_s2 + $0x8] sm:$0xff] %v198_v26  ;;  %v200_v28 = vsel %vm184_vm4, %v174_v19, %v192_v23  ;;  %v195_v29 = vmul.f32 0.2, %v176_v25  ;;  %v135_v30 = vpop.f32.mrf.mxu0  ;;  %v178_v31 = vpop.f32.mrf.mxu1 }
  0xd5   :  { %208 = vst [vmem:[%s333_s2 + $0x18] sm:$0xff] %v200_v28  ;;  %v201_v32 = vsel %vm185_vm5, %v133_v24, %v193_v27  ;;  %vm186_vm7 = vcmp.gt.f32.partialorder %v135_v30, 0.0  ;;  %v194_v33 = vmul.f32 0.2, %v135_v30  ;;  %vm188_vm8 = vcmp.gt.f32.partialorder %v178_v31, 0.0 }
  0xd6   :  { %209 = vst [vmem:[%s333_s2 + $0x20] sm:$0xff] %v201_v32  ;;  %v203_v34 = vsel %vm187_vm6, %v176_v25, %v195_v29  ;;  %v196_v35 = vmul.f32 0.2, %v178_v31 }
  0xd7   :  { %211 = vst [vmem:[%s333_s2 + $0x30] sm:$0xff] %v203_v34  ;;  %v202_v36 = vsel %vm186_vm7, %v135_v30, %v194_v33 }
  0xd8   :  { %210 = vst [vmem:[%s333_s2 + $0x28] sm:$0xff] %v202_v36  ;;  %v204_v37 = vsel %vm188_vm8, %v178_v31, %v196_v35 }
  0xd9   :  { %212 = vst [vmem:[%s333_s2 + $0x38] sm:$0xff] %v204_v37 }

// kernel: dcdiscriminator_forward.4
= control target key start
LH: loop header
LB: loop body
LE: loop exit
PB: predicated region body
PF: predicated region fallthrough
CT: control target
= control target key end

     0   :  { %v437_v20 = vmov 0   ;;  %s559_s1 = inlined_call_operand.vmem [shape: bf16[256,128], index: 1, kind: input, shape index: {}]   ;;  %s560_s0 = inlined_call_operand.vmem [shape: bf16[32,256], index: 0, kind: input, shape index: {}]   ;;  %s561_s2 = inlined_call_operand.vmem [shape: f32[32,1], index: 2, kind: input, shape index: {}]   ;;  %s562_s3 = inlined_call_operand.vmem [shape: f32[32,1], index: 3, kind: input, shape index: {}]   ;;  %s563_s4 = inlined_call_operand.vmem [shape: f32[32,128], index: 4, kind: output, shape index: {}]  }
   0x1   :  { %v407_v0 = vld [vmem:[%s559_s1 + $0x78] sm:$0xff]   ;;  %v409_v2 = vld [vmem:[%s559_s1 + $0x70] sm:$0xff]   ;;  %v411_v4 = vld [vmem:[%s559_s1 + $0x68] sm:$0xff]   ;;  %406 = vset.pattern.permute.xlu1 %v437_v20  ;;  %405 = vset.pattern.permute.xlu0 %v437_v20 }
   0x2   :  { %v408_v1 = vld [vmem:[%s559_s1 + $0x38] sm:$0xff]   ;;  %360 = vmatprep.subr.bf16.mxu0 %v407_v0  ;;  %388 = vmatprep.subr.bf16.mxu1 %v407_v0  ;;  %v410_v3 = vld [vmem:[%s559_s1 + $0x30] sm:$0xff]   ;;  %v412_v5 = vld [vmem:[%s559_s1 + $0x28] sm:$0xff]  }
   0x3   :  { %361 = vmatpush3.bf16.msra.mxu0 %v408_v1  ;;  %396 = vmatpush3.bf16.msra.mxu1 %v408_v1  ;;  %v413_v6 = vld [vmem:[%s559_s1 + $0x60] sm:$0xff]   ;;  %v415_v8 = vld [vmem:[%s559_s1 + $0x58] sm:$0xff]   ;;  %v417_v10 = vld [vmem:[%s559_s1 + $0x50] sm:$0xff]  }
   0x4   :  { %362 = vmatprep.subr.bf16.mxu0 %v409_v2  ;;  %389 = vmatprep.subr.bf16.mxu1 %v409_v2  ;;  %v414_v7 = vld [vmem:[%s559_s1 + $0x20] sm:$0xff]   ;;  %v416_v9 = vld [vmem:[%s559_s1 + $0x18] sm:$0xff]   ;;  %v418_v13 = vld [vmem:[%s559_s1 + $0x10] sm:$0xff]  }
   0x5   :  { %v425_v11 = vld [vmem:[%s560_s0 + $0x4] ss:$8 sps:$4 sm:$0xff]   ;;  %v428_v12 = vld [vmem:[%s560_s0 + $0x14] ss:$8 sps:$4 sm:$0xff]   ;;  %v423_v18 = vld [vmem:[%s560_s0] ss:$8 sps:$4 sm:$0xff]  }
   0x6   :  { %v419_v14 = vld [vmem:[%s559_s1 + $0x48] sm:$0xff]   ;;  %202 = vmatprep.mubr.bf16.mxu0 %v425_v11  ;;  %210 = vmatprep.mubr.bf16.mxu1 %v428_v12  ;;  %v421_v16 = vld [vmem:[%s559_s1 + $0x40] sm:$0xff]   ;;  %v426_v19 = vld [vmem:[%s560_s0 + $0x10] ss:$8 sps:$4 sm:$0xff]  }
   0x7   :  { %363 = vmatpush3.bf16.msra.mxu0 %v410_v3  ;;  %397 = vmatpush3.bf16.msra.mxu1 %v410_v3  ;;  %v420_v15 = vld [vmem:[%s559_s1 + $0x8] sm:$0xff]   ;;  %v422_v17 = vld [vmem:[%s559_s1] sm:$0xff]   ;;  %v221_v34 = vld [vmem:[%s561_s2 + $0x10] sm:$0xff] }
   0x8   :  { %364 = vmatprep.subr.bf16.mxu0 %v411_v4  ;;  %390 = vmatprep.subr.bf16.mxu1 %v411_v4  ;;  %v220_v33 = vld [vmem:[%s561_s2 + $0x8] sm:$0xff]  ;;  %v222_v35 = vld [vmem:[%s561_s2 + $0x18] sm:$0xff]  ;;  %v223_v36 = vld [vmem:[%s562_s3] sm:$0xff] }
   0x9   :  { %v224_v37 = vld [vmem:[%s562_s3 + $0x8] sm:$0xff]  ;;  %v225_v38 = vld [vmem:[%s562_s3 + $0x10] sm:$0xff]  ;;  %v226_v55 = vld [vmem:[%s562_s3 + $0x18] sm:$0xff] }
   0xa   :  { %v219_v56 = vld [vmem:[%s561_s2] sm:$0xff] }
   0xb   :  { %365 = vmatpush3.bf16.msra.mxu0 %v412_v5  ;;  %398 = vmatpush3.bf16.msra.mxu1 %v412_v5 }
   0xc   :  { %366 = vmatprep.subr.bf16.mxu0 %v413_v6  ;;  %391 = vmatprep.subr.bf16.mxu1 %v413_v6 }
   0xf   :  { %367 = vmatpush3.bf16.msra.mxu0 %v414_v7  ;;  %399 = vmatpush3.bf16.msra.mxu1 %v414_v7 }
  0x10   :  { %368 = vmatprep.subr.bf16.mxu0 %v415_v8  ;;  %392 = vmatprep.subr.bf16.mxu1 %v415_v8 }
  0x13   :  { %369 = vmatpush3.bf16.msra.mxu0 %v416_v9  ;;  %400 = vmatpush3.bf16.msra.mxu1 %v416_v9 }
  0x14   :  { %370 = vmatprep.subr.bf16.mxu0 %v417_v10  ;;  %393 = vmatprep.subr.bf16.mxu1 %v417_v10 }
  0x17   :  { %371 = vmatpush3.bf16.msra.mxu0 %v418_v13  ;;  %401 = vmatpush3.bf16.msra.mxu1 %v418_v13 }
  0x18   :  { %372 = vmatprep.subr.bf16.mxu0 %v419_v14  ;;  %394 = vmatprep.subr.bf16.mxu1 %v419_v14 }
  0x1b   :  { %373 = vmatpush3.bf16.msra.mxu0 %v420_v15  ;;  %402 = vmatpush3.bf16.msra.mxu1 %v420_v15 }
  0x1c   :  { %374 = vmatprep.subr.bf16.mxu0 %v421_v16  ;;  %395 = vmatprep.subr.bf16.mxu1 %v421_v16 }
  0x1f   :  { %375 = vmatpush3.bf16.msra.mxu0 %v422_v17  ;;  %403 = vmatpush3.bf16.msra.mxu1 %v422_v17 }
  0x22   :  { %203 = vmatmul.mubr.bf16.vlgmr.msra.gmra.mxu0 %v423_v18  ;;  %211 = vmatmul.mubr.bf16.vlgmr.msra.gmra.mxu1 %v426_v19 }
  0xe2   :  { %v376_v21 = vpop.f32.mrf.mxu0  ;;  %v382_v22 = vpop.f32.mrf.mxu1 }
  0xe4   :  { %v377_v23 = vpop.f32.mrf.mxu0  ;;  %v383_v24 = vpop.f32.mrf.mxu1 }
  0xe5   :  { %v378_v25 = vadd.f32 %v377_v23, %v376_v21  ;;  %v384_v26 = vadd.f32 %v383_v24, %v382_v22 }
  0xe6   :  { %v379_v27 = vpop.f32.mrf.mxu0  ;;  %v385_v28 = vpop.f32.mrf.mxu1 }
  0xe7   :  { %231 = vadd.xlane.f32.xlu1 %v384_v26  ;;  %227 = vadd.xlane.f32.xlu0 %v378_v25 }
  0xe8   :  { %v380_v29 = vpop.f32.mrf.mxu0  ;;  %v386_v30 = vpop.f32.mrf.mxu1 }
  0xe9   :  { %v381_v31 = vadd.f32 %v380_v29, %v379_v27  ;;  %v387_v32 = vadd.f32 %v386_v30, %v385_v28 }
  0xeb   :  { %233 = vadd.xlane.f32.xlu1 %v387_v32  ;;  %229 = vadd.xlane.f32.xlu0 %v381_v31 }
  0xfc   :  { %279 = vperm.xlu1 %406, %v220_v33  }
 0x100   :  { %284 = vperm.xlu1 %406, %v221_v34  }
 0x104   :  { %289 = vperm.xlu1 %406, %v222_v35  }
 0x108   :  { %298 = vperm.xlu1 %406, %v223_v36  }
 0x10c   :  { %303 = vperm.xlu1 %406, %v224_v37  }
 0x110   :  { %308 = vperm.xlu1 %406, %v225_v38  }
 0x170   :  { %v232_v39 = vpop.xlane.xlu1 %231  ;;  %v228_v40 = vpop.xlane.xlu0 %227 }
 0x171   :  { %v238_v41 = vmul.f32 0.0078125, %v232_v39  ;;  %v236_v42 = vmul.f32 0.0078125, %v228_v40 }
 0x173   :  { %v240_v43 = vsub.f32 %v378_v25, %v236_v42  ;;  %v242_v46 = vsub.f32 %v384_v26, %v238_v41 }
 0x174   :  { %v234_v44 = vpop.xlane.xlu1 %233  ;;  %v230_v45 = vpop.xlane.xlu0 %229 }
 0x175   :  { %v239_v47 = vmul.f32 0.0078125, %v234_v44  ;;  %v237_v48 = vmul.f32 0.0078125, %v230_v45  ;;  %v244_v49 = vmul.f32 %v240_v43, %v240_v43  ;;  %v246_v52 = vmul.f32 %v242_v46, %v242_v46 }
 0x177   :  { %v241_v50 = vsub.f32 %v381_v31, %v237_v48  ;;  %248 = vadd.xlane.f32.xlu0 %v244_v49  ;;  %v243_v51 = vsub.f32 %v387_v32, %v239_v47 }
 0x178   :  { %v280_v57 = vpop.permute.xlu1 %279 }
 0x179   :  { %v245_v53 = vmul.f32 %v241_v50, %v241_v50  ;;  %v247_v54 = vmul.f32 %v243_v51, %v243_v51 }
 0x17b   :  { %252 = vadd.xlane.f32.xlu0 %v246_v52  ;;  %250 = vadd.xlane.f32.xlu1 %v245_v53 }
 0x17c   :  { %v285_v58 = vpop.permute.xlu1 %284 }
 0x17f   :  { %254 = vadd.xlane.f32.xlu1 %v247_v54 }
 0x180   :  { %v290_v59 = vpop.permute.xlu1 %289 }
 0x184   :  { %v299_v60 = vpop.permute.xlu1 %298 }
 0x188   :  { %v304_v61 = vpop.permute.xlu1 %303 }
 0x18c   :  { %v309_v62 = vpop.permute.xlu1 %308 }
 0x190   :  { %313 = vperm.xlu1 %406, %v226_v55  }
 0x191   :  { %274 = vperm.xlu0 %405, %v219_v56  }
 0x200   :  { %v249_v63 = vpop.xlane.xlu0 %248 }
 0x201   :  { %v256_v0 = vmul.f32 0.0078125, %v249_v63 }
 0x203   :  { %v260_v1 = vadd.f32 1e-05, %v256_v0 }
 0x204   :  { %v251_v2 = vpop.xlane.xlu1 %250  ;;  %v253_v3 = vpop.xlane.xlu0 %252 }
 0x205   :  { %429 = vrsqrt.f32 %v260_v1  ;;  %v257_v4 = vmul.f32 0.0078125, %v251_v2  ;;  %v258_v5 = vmul.f32 0.0078125, %v253_v3 }
 0x207   :  { %v261_v6 = vadd.f32 1e-05, %v257_v4  ;;  %v262_v7 = vadd.f32 1e-05, %v258_v5 }
 0x208   :  { %v255_v8 = vpop.xlane.xlu1 %254 }
 0x209   :  { %431 = vrsqrt.f32 %v261_v6  ;;  %v259_v9 = vmul.f32 0.0078125, %v255_v8 }
 0x20a   :  { %433 = vrsqrt.f32 %v262_v7 }
 0x20b   :  { %v263_v10 = vadd.f32 1e-05, %v259_v9 }
 0x20c   :  { %v275_v12 = vpop.permute.xlu0 %274  ;;  %v314_v30 = vpop.permute.xlu1 %313 }
 0x20d   :  { %435 = vrsqrt.f32 %v263_v10 }
 0x212   :  { %v430_v11 = vpop.eup %429 }
 0x213   :  { %v268_v13 = vmul.f32 %v430_v11, %v240_v43 }
 0x215   :  { %v292_v14 = vmul.f32 %v275_v12, %v268_v13 }
 0x216   :  { %v432_v15 = vpop.eup %431 }
 0x217   :  { %v434_v16 = vpop.eup %433  ;;  %v269_v17 = vmul.f32 %v432_v15, %v241_v50  ;;  %v316_v18 = vadd.f32 %v299_v60, %v292_v14 }
 0x218   :  { %v270_v19 = vmul.f32 %v434_v16, %v242_v46 }
 0x219   :  { %v293_v20 = vmul.f32 %v280_v57, %v269_v17  ;;  %vm320_vm0 = vcmp.gt.f32.partialorder %v316_v18, 0.0  ;;  %v324_v21 = vmul.f32 0.2, %v316_v18 }
 0x21a   :  { %v436_v22 = vpop.eup %435  ;;  %v294_v23 = vmul.f32 %v285_v58, %v270_v19 }
 0x21b   :  { %v271_v24 = vmul.f32 %v436_v22, %v243_v51  ;;  %v317_v25 = vadd.f32 %v304_v61, %v293_v20  ;;  %v328_v26 = vsel %vm320_vm0, %v316_v18, %v324_v21 }
 0x21c   :  { %v318_v27 = vadd.f32 %v309_v62, %v294_v23  ;;  %332 = vst [vmem:[%s563_s4] sm:$0xff] %v328_v26 }
 0x21d   :  { %v295_v28 = vmul.f32 %v290_v59, %v271_v24  ;;  %vm321_vm1 = vcmp.gt.f32.partialorder %v317_v25, 0.0  ;;  %v325_v29 = vmul.f32 0.2, %v317_v25 }
 0x21e   :  { %vm322_vm2 = vcmp.gt.f32.partialorder %v318_v27, 0.0  ;;  %v326_v31 = vmul.f32 0.2, %v318_v27 }
 0x21f   :  { %v329_v32 = vsel %vm321_vm1, %v317_v25, %v325_v29  ;;  %v319_v33 = vadd.f32 %v314_v30, %v295_v28 }
 0x220   :  { %333 = vst [vmem:[%s563_s4 + $0x8] sm:$0xff] %v329_v32  ;;  %v330_v34 = vsel %vm322_vm2, %v318_v27, %v326_v31 }
 0x221   :  { %vm323_vm3 = vcmp.gt.f32.partialorder %v319_v33, 0.0  ;;  %v327_v35 = vmul.f32 0.2, %v319_v33  ;;  %334 = vst [vmem:[%s563_s4 + $0x10] sm:$0xff] %v330_v34 }
 0x223   :  { %v331_v36 = vsel %vm323_vm3, %v319_v33, %v327_v35 }
 0x224   :  { %335 = vst [vmem:[%s563_s4 + $0x18] sm:$0xff] %v331_v36 }

// kernel: dcdiscriminator_forward.5
= control target key start
LH: loop header
LB: loop body
LE: loop exit
PB: predicated region body
PF: predicated region fallthrough
CT: control target
= control target key end

     0   :  { %s1526_s0 = inlined_call_operand.vmem [shape: bf16[64,512], index: 0, kind: input, shape index: {}]   ;;  %s1527_s1 = inlined_call_operand.vmem [shape: bf16[512,32], index: 1, kind: input, shape index: {}]   ;;  %s1528_s2 = inlined_call_operand.vmem [shape: f32[64,1], index: 2, kind: input, shape index: {}]   ;;  %s1529_s3 = inlined_call_operand.vmem [shape: f32[64,1], index: 3, kind: input, shape index: {}]   ;;  %s1530_s4 = inlined_call_operand.vmem [shape: f32[64,32], index: 4, kind: input, shape index: {}]   ;;  %s1531_s5 = inlined_call_operand.vmem [shape: f32[32,2], index: 5, kind: input, shape index: {}]   ;;  %s1532_s6 = inlined_call_operand.hbm [shape: f32[1,2], index: 6, kind: output, shape index: {}]  }
   0x1   :  { %v1030_v0 = vld [vmem:[%s1527_s1 + $0x78] sm:$0xff]   ;;  %v1034_v4 = vld [vmem:[%s1527_s1 + $0x70] sm:$0xff]   ;;  %v1038_v8 = vld [vmem:[%s1527_s1 + $0x68] sm:$0xff]  }
   0x2   :  { %v1031_v1 = vld [vmem:[%s1527_s1 + $0xf8] sm:$0xff]   ;;  %928 = vmatprep.subr.bf16.mxu0 %v1030_v0  ;;  %v1035_v5 = vld [vmem:[%s1527_s1 + $0xf0] sm:$0xff]   ;;  %v1039_v9 = vld [vmem:[%s1527_s1 + $0xe8] sm:$0xff]  }
   0x3   :  { %v1032_v2 = vld [vmem:[%s1527_s1 + $0x38] sm:$0xff]   ;;  %968 = vmatprep.subr.bf16.mxu1 %v1031_v1  ;;  %v1036_v6 = vld [vmem:[%s1527_s1 + $0x30] sm:$0xff]   ;;  %v1040_v10 = vld [vmem:[%s1527_s1 + $0x28] sm:$0xff]  }
   0x4   :  { %v1033_v3 = vld [vmem:[%s1527_s1 + $0xb8] sm:$0xff]   ;;  %929 = vmatpush3.bf16.msra.mxu0 %v1032_v2  ;;  %v1037_v7 = vld [vmem:[%s1527_s1 + $0xb0] sm:$0xff]   ;;  %v1041_v11 = vld [vmem:[%s1527_s1 + $0xa8] sm:$0xff]  }
   0x5   :  { %969 = vmatpush3.bf16.msra.mxu1 %v1033_v3  ;;  %930 = vmatprep.subr.bf16.mxu0 %v1034_v4  ;;  %v1042_v12 = vld [vmem:[%s1527_s1 + $0x60] sm:$0xff]   ;;  %v1046_v16 = vld [vmem:[%s1527_s1 + $0x58] sm:$0xff]   ;;  %v1050_v20 = vld [vmem:[%s1527_s1 + $0x50] sm:$0xff]  }
   0x6   :  { %970 = vmatprep.subr.bf16.mxu1 %v1035_v5  ;;  %v1043_v13 = vld [vmem:[%s1527_s1 + $0xe0] sm:$0xff]   ;;  %v1047_v17 = vld [vmem:[%s1527_s1 + $0xd8] sm:$0xff]   ;;  %v1051_v21 = vld [vmem:[%s1527_s1 + $0xd0] sm:$0xff]  }
   0x7   :  { %v1044_v14 = vld [vmem:[%s1527_s1 + $0x20] sm:$0xff]   ;;  %v1048_v18 = vld [vmem:[%s1527_s1 + $0x18] sm:$0xff]   ;;  %v1052_v22 = vld [vmem:[%s1527_s1 + $0x10] sm:$0xff]  }
   0x8   :  { %931 = vmatpush3.bf16.msra.mxu0 %v1036_v6  ;;  %v1045_v15 = vld [vmem:[%s1527_s1 + $0xa0] sm:$0xff]   ;;  %v1049_v19 = vld [vmem:[%s1527_s1 + $0x98] sm:$0xff]   ;;  %v1053_v23 = vld [vmem:[%s1527_s1 + $0x90] sm:$0xff]  }
   0x9   :  { %971 = vmatpush3.bf16.msra.mxu1 %v1037_v7  ;;  %932 = vmatprep.subr.bf16.mxu0 %v1038_v8  ;;  %v1054_v24 = vld [vmem:[%s1527_s1 + $0x48] sm:$0xff]   ;;  %v1058_v28 = vld [vmem:[%s1527_s1 + $0x40] sm:$0xff]  }
   0xa   :  { %972 = vmatprep.subr.bf16.mxu1 %v1039_v9  ;;  %v1055_v25 = vld [vmem:[%s1527_s1 + $0xc8] sm:$0xff]   ;;  %v1059_v29 = vld [vmem:[%s1527_s1 + $0xc0] sm:$0xff]  }
   0xb   :  { %v1056_v26 = vld [vmem:[%s1527_s1 + $0x8] sm:$0xff]   ;;  %v1060_v30 = vld [vmem:[%s1527_s1] sm:$0xff]  }
   0xc   :  { %933 = vmatpush3.bf16.msra.mxu0 %v1040_v10  ;;  %v1057_v27 = vld [vmem:[%s1527_s1 + $0x88] sm:$0xff]   ;;  %v1061_v31 = vld [vmem:[%s1527_s1 + $0x80] sm:$0xff]  }
   0xd   :  { %973 = vmatpush3.bf16.msra.mxu1 %v1041_v11  ;;  %934 = vmatprep.subr.bf16.mxu0 %v1042_v12  ;;  %v1062_v32 = vld [vmem:[%s1526_s0] ss:$16 sps:$4 sm:$0xff]   ;;  %v1064_v33 = vld [vmem:[%s1526_s0 + $0x4] ss:$16 sps:$4 sm:$0xff]   ;;  %v1065_v34 = vld [vmem:[%s1526_s0 + $0x8] ss:$16 sps:$4 sm:$0xff]  }
   0xe   :  { %974 = vmatprep.subr.bf16.mxu1 %v1043_v13  ;;  %v1067_v35 = vld [vmem:[%s1526_s0 + $0xc] ss:$16 sps:$4 sm:$0xff]   ;;  %409 = vmatprep.mubr.bf16.mxu0 %v1064_v33  ;;  %v1068_v36 = vld [vmem:[%s1526_s0 + $0x24] ss:$16 sps:$4 sm:$0xff]   ;;  %v1072_v38 = vld [vmem:[%s1526_s0 + $0x20] ss:$16 sps:$4 sm:$0xff]  }
   0xf   :  { %474 = vmatprep.mubr.bf16.mxu1 %v1067_v35  ;;  %v1070_v37 = vld [vmem:[%s1526_s0 + $0x2c] ss:$16 sps:$4 sm:$0xff]   ;;  %v1073_v39 = vld [vmem:[%s1526_s0 + $0x28] ss:$16 sps:$4 sm:$0xff]   ;;  %v1074_v40 = vld [vmem:[%s1526_s0 + $0x44] ss:$16 sps:$4 sm:$0xff]  }
  0x10   :  { %935 = vmatpush3.bf16.msra.mxu0 %v1044_v14  ;;  %v1076_v41 = vld [vmem:[%s1526_s0 + $0x4c] ss:$16 sps:$4 sm:$0xff]  }
  0x11   :  { %975 = vmatpush3.bf16.msra.mxu1 %v1045_v15  ;;  %936 = vmatprep.subr.bf16.mxu0 %v1046_v16 }
  0x12   :  { %976 = vmatprep.subr.bf16.mxu1 %v1047_v17 }
  0x14   :  { %937 = vmatpush3.bf16.msra.mxu0 %v1048_v18 }
  0x15   :  { %977 = vmatpush3.bf16.msra.mxu1 %v1049_v19  ;;  %938 = vmatprep.subr.bf16.mxu0 %v1050_v20 }
  0x16   :  { %978 = vmatprep.subr.bf16.mxu1 %v1051_v21 }
  0x18   :  { %939 = vmatpush3.bf16.msra.mxu0 %v1052_v22 }
  0x19   :  { %979 = vmatpush3.bf16.msra.mxu1 %v1053_v23  ;;  %940 = vmatprep.subr.bf16.mxu0 %v1054_v24 }
  0x1a   :  { %980 = vmatprep.subr.bf16.mxu1 %v1055_v25 }
  0x1c   :  { %941 = vmatpush3.bf16.msra.mxu0 %v1056_v26 }
  0x1d   :  { %981 = vmatpush3.bf16.msra.mxu1 %v1057_v27  ;;  %942 = vmatprep.subr.bf16.mxu0 %v1058_v28 }
  0x1e   :  { %982 = vmatprep.subr.bf16.mxu1 %v1059_v29 }
  0x20   :  { %943 = vmatpush3.bf16.msra.mxu0 %v1060_v30 }
  0x21   :  { %983 = vmatpush3.bf16.msra.mxu1 %v1061_v31 }
  0x23   :  { %410 = vmatmul.mubr.bf16.vlgmr.msra.gmra.mxu0 %v1062_v32 }
  0x24   :  { %475 = vmatmul.mubr.bf16.vlgmr.msra.gmra.mxu1 %v1065_v34  ;;  %417 = vmatprep.mubr.bf16.mxu0 %v1068_v36 }
  0x25   :  { %482 = vmatprep.mubr.bf16.mxu1 %v1070_v37 }
  0x26   :  { %11 = vsyncpa [#allocation3], 0  ;;  %v1078_v42 = vld [vmem:[%s1526_s0 + $0x40] ss:$16 sps:$4 sm:$0xff]   ;;  %v1079_v43 = vld [vmem:[%s1526_s0 + $0x48] ss:$16 sps:$4 sm:$0xff]  }
  0x27   :  { %v1080_v44 = vld [vmem:[%s1526_s0 + $0x64] ss:$16 sps:$4 sm:$0xff]   ;;  %v1082_v45 = vld [vmem:[%s1526_s0 + $0x6c] ss:$16 sps:$4 sm:$0xff]   ;;  %v1084_v46 = vld [vmem:[%s1526_s0 + $0x60] ss:$16 sps:$4 sm:$0xff]  }
  0x28   :  { %v1085_v47 = vld [vmem:[%s1526_s0 + $0x68] ss:$16 sps:$4 sm:$0xff]   ;;  %v1124_v48 = vmov 0   ;;  %vm523_vm0 = vcmask 261120   ;;  %vm1126_vm1 = vmmov 0   ;;  %vm863_vm10 = vcmask 8192  }
  0x29   :  { %1029 = vset.pattern.permute.xlu1 %v1124_v48  ;;  %1028 = vset.pattern.permute.xlu0 %v1124_v48  ;;  %v513_v48 = vld [vmem:[%s1528_s2 + $0x30] sm:$0xff] }
  0x2b   :  { %418 = vmatmul.mubr.bf16.gmra.mxu0 %v1072_v38 }
  0x2c   :  { %483 = vmatmul.mubr.bf16.gmra.mxu1 %v1073_v39  ;;  %425 = vmatprep.mubr.bf16.mxu0 %v1074_v40 }
  0x2d   :  { %490 = vmatprep.mubr.bf16.mxu1 %v1076_v41  ;;  %v508_v41 = vld [vmem:[%s1528_s2 + $0x8] sm:$0xff] }
  0x33   :  { %426 = vmatmul.mubr.bf16.gmra.mxu0 %v1078_v42  ;;  %v509_v42 = vld [vmem:[%s1528_s2 + $0x10] sm:$0xff] }
  0x34   :  { %491 = vmatmul.mubr.bf16.gmra.mxu1 %v1079_v43  ;;  %433 = vmatprep.mubr.bf16.mxu0 %v1080_v44  ;;  %v515_v43 = vld [vmem:[%s1529_s3] sm:$0xff] }
  0x35   :  { %498 = vmatprep.mubr.bf16.mxu1 %v1082_v45  ;;  %v507_v44 = vld [vmem:[%s1528_s2] sm:$0xff]  ;;  %v516_v45 = vld [vmem:[%s1529_s3 + $0x8] sm:$0xff] }
  0x3b   :  { %434 = vmatmul.mubr.bf16.gmra.mxu0 %v1084_v46  ;;  %v512_v46 = vld [vmem:[%s1528_s2 + $0x28] sm:$0xff] }
  0x3c   :  { %499 = vmatmul.mubr.bf16.gmra.mxu1 %v1085_v47  ;;  %v510_v47 = vld [vmem:[%s1528_s2 + $0x18] sm:$0xff] }
  0xe3   :  { %v944_v49 = vpop.f32.mrf.mxu0 }
  0xe4   :  { %v984_v50 = vpop.f32.mrf.mxu1 }
  0xe5   :  { %v945_v51 = vpop.f32.mrf.mxu0 }
  0xe6   :  { %v946_v52 = vadd.f32 %v945_v51, %v944_v49  ;;  %v985_v53 = vpop.f32.mrf.mxu1  ;;  %v517_v49 = vld [vmem:[%s1529_s3 + $0x10] sm:$0xff]  ;;  %v511_v51 = vld [vmem:[%s1528_s2 + $0x20] sm:$0xff] }
  0xe7   :  { %v986_v54 = vadd.f32 %v985_v53, %v984_v50  ;;  %v947_v55 = vpop.f32.mrf.mxu0  ;;  %v514_v50 = vld [vmem:[%s1528_s2 + $0x38] sm:$0xff] }
  0xe8   :  { %v987_v56 = vpop.f32.mrf.mxu1 }
  0xe9   :  { %v948_v57 = vpop.f32.mrf.mxu0  ;;  %v1307_v58 = vadd.f32 %v986_v54, %v946_v52  ;;  %v518_v52 = vld [vmem:[%s1529_s3 + $0x18] sm:$0xff] }
  0xea   :  { %v949_v59 = vadd.f32 %v948_v57, %v947_v55  ;;  %v988_v60 = vpop.f32.mrf.mxu1 }
  0xeb   :  { %v989_v61 = vadd.f32 %v988_v60, %v987_v56  ;;  %v950_v62 = vpop.f32.mrf.mxu0  ;;  %v524_v63 = vsel %vm523_vm0, %v1307_v58, 0.0 }
  0xec   :  { %v990_v0 = vpop.f32.mrf.mxu1  ;;  %525 = vadd.xlane.f32.xlu0 %v524_v63  ;;  %v520_v63 = vld [vmem:[%s1529_s3 + $0x28] sm:$0xff] }
  0xed   :  { %v951_v1 = vpop.f32.mrf.mxu0  ;;  %v1311_v2 = vadd.f32 %v989_v61, %v949_v59 }
  0xee   :  { %v952_v3 = vadd.f32 %v951_v1, %v950_v62  ;;  %v991_v4 = vpop.f32.mrf.mxu1  ;;  %v519_v62 = vld [vmem:[%s1529_s3 + $0x20] sm:$0xff] }
  0xef   :  { %v992_v5 = vadd.f32 %v991_v4, %v990_v0  ;;  %v953_v6 = vpop.f32.mrf.mxu0  ;;  %v527_v7 = vsel %vm523_vm0, %v1311_v2, 0.0 }
  0xf0   :  { %v993_v8 = vpop.f32.mrf.mxu1  ;;  %528 = vadd.xlane.f32.xlu0 %v527_v7 }
  0xf1   :  { %v954_v9 = vpop.f32.mrf.mxu0  ;;  %v1315_v10 = vadd.f32 %v992_v5, %v952_v3 }
  0xf2   :  { %v955_v11 = vadd.f32 %v954_v9, %v953_v6  ;;  %v994_v12 = vpop.f32.mrf.mxu1 }
  0xf3   :  { %v995_v13 = vadd.f32 %v994_v12, %v993_v8  ;;  %v956_v14 = vpop.f32.mrf.mxu0  ;;  %v530_v15 = vsel %vm523_vm0, %v1315_v10, 0.0 }
  0xf4   :  { %v996_v16 = vpop.f32.mrf.mxu1  ;;  %531 = vadd.xlane.f32.xlu1 %v530_v15 }
  0xf5   :  { %v957_v17 = vpop.f32.mrf.mxu0  ;;  %v1319_v18 = vadd.f32 %v995_v13, %v955_v11 }
  0xf6   :  { %v958_v19 = vadd.f32 %v957_v17, %v956_v14  ;;  %v997_v20 = vpop.f32.mrf.mxu1 }
  0xf7   :  { %v998_v21 = vadd.f32 %v997_v20, %v996_v16  ;;  %v959_v22 = vpop.f32.mrf.mxu0  ;;  %v533_v23 = vsel %vm523_vm0, %v1319_v18, 0.0 }
  0xf8   :  { %v999_v24 = vpop.f32.mrf.mxu1  ;;  %534 = vadd.xlane.f32.xlu1 %v533_v23 }
  0xf9   :  { %v960_v25 = vpop.f32.mrf.mxu0  ;;  %v1323_v26 = vadd.f32 %v998_v21, %v958_v19 }
  0xfa   :  { %v961_v27 = vadd.f32 %v960_v25, %v959_v22  ;;  %v1000_v28 = vpop.f32.mrf.mxu1 }
  0xfb   :  { %v1001_v29 = vadd.f32 %v1000_v28, %v999_v24  ;;  %v962_v30 = vpop.f32.mrf.mxu0  ;;  %v536_v31 = vsel %vm523_vm0, %v1323_v26, 0.0 }
  0xfc   :  { %v1002_v32 = vpop.f32.mrf.mxu1  ;;  %537 = vadd.xlane.f32.xlu0 %v536_v31 }
  0xfd   :  { %v963_v33 = vpop.f32.mrf.mxu0  ;;  %v1327_v34 = vadd.f32 %v1001_v29, %v961_v27 }
  0xfe   :  { %v964_v35 = vadd.f32 %v963_v33, %v962_v30  ;;  %v1003_v36 = vpop.f32.mrf.mxu1 }
  0xff   :  { %v1004_v37 = vadd.f32 %v1003_v36, %v1002_v32  ;;  %v539_v38 = vsel %vm523_vm0, %v1327_v34, 0.0  ;;  %v965_v53 = vpop.f32.mrf.mxu0 }
 0x100   :  { %540 = vadd.xlane.f32.xlu1 %v539_v38  ;;  %v1005_v54 = vpop.f32.mrf.mxu1 }
 0x101   :  { %v1331_v39 = vadd.f32 %v1004_v37, %v964_v35  ;;  %v966_v55 = vpop.f32.mrf.mxu0 }
 0x102   :  { %v1006_v56 = vpop.f32.mrf.mxu1  ;;  %v967_v57 = vadd.f32 %v966_v55, %v965_v53  ;;  %v786_v53 = vld [vmem:[%s1531_s5] sm:$0xff] }
 0x103   :  { %v542_v40 = vsel %vm523_vm0, %v1331_v39, 0.0  ;;  %v1007_v59 = vadd.f32 %v1006_v56, %v1005_v54 }
 0x104   :  { %543 = vadd.xlane.f32.xlu0 %v542_v40 }
 0x105   :  { %v504_v60 = vadd.f32 %v1007_v59, %v967_v57 }
 0x107   :  { %v545_v61 = vsel %vm523_vm0, %v504_v60, 0.0 }
 0x111   :  { %636 = vperm.xlu1 %1029, %v508_v41  }
 0x115   :  { %641 = vperm.xlu1 %1029, %v509_v42  }
 0x119   :  { %679 = vperm.xlu1 %1029, %v515_v43  }
 0x11a   :  { %631 = vperm.xlu0 %1028, %v507_v44  }
 0x11d   :  { %684 = vperm.xlu1 %1029, %v516_v45  }
 0x11e   :  { %656 = vperm.xlu0 %1028, %v512_v46  }
 0x121   :  { %646 = vperm.xlu1 %1029, %v510_v47  }
 0x122   :  { %661 = vperm.xlu0 %1028, %v513_v48   ;;  %v521_v48 = vld [vmem:[%s1529_s3 + $0x30] sm:$0xff] }
 0x125   :  { %689 = vperm.xlu1 %1029, %v517_v49   ;;  %v1125_v49 = vmov 0.0  }
 0x126   :  { %666 = vperm.xlu0 %1028, %v514_v50   ;;  %1013 = vmatprep.subr.mxu0 %v1125_v49  ;;  %v789_v50 = vld [vmem:[%s1531_s5 + $0x18] sm:$0xff] }
 0x127   :  { %1014 = vmatpush3.msra.mxu0 %v789_v50  ;;  %1021 = vmatprep.mubr.msk.f32.mxu0 %vm1126_vm1, %v1125_v49 }
 0x128   :  { %1015 = vmatprep.subr.mxu0 %v1125_v49 }
 0x129   :  { %651 = vperm.xlu1 %1029, %v511_v51   ;;  %v788_v51 = vld [vmem:[%s1531_s5 + $0x10] sm:$0xff] }
 0x12a   :  { %1016 = vmatpush3.msra.mxu0 %v788_v51 }
 0x12b   :  { %1017 = vmatprep.subr.mxu0 %v1125_v49 }
 0x12d   :  { %694 = vperm.xlu1 %1029, %v518_v52   ;;  %v787_v52 = vld [vmem:[%s1531_s5 + $0x8] sm:$0xff] }
 0x12e   :  { %1018 = vmatpush3.msra.mxu0 %v787_v52 }
 0x12f   :  { %1019 = vmatprep.subr.mxu0 %v1125_v49 }
 0x130   :  { %1020 = vmatpush3.msra.mxu0 %v786_v53 }
 0x151   :  { %546 = vadd.xlane.f32.xlu1 %v545_v61 }
 0x162   :  { %699 = vperm.xlu1 %1029, %v519_v62  }
 0x166   :  { %704 = vperm.xlu1 %1029, %v520_v63  }
 0x175   :  { %v526_v0 = vpop.xlane.xlu0 %525 }
 0x176   :  { %v549_v1 = vmul.f32 0.03125, %v526_v0 }
 0x178   :  { %v1379_v3 = vsub.f32 %v1307_v58, %v549_v1 }
 0x179   :  { %v529_v4 = vpop.xlane.xlu0 %528 }
 0x17a   :  { %v565_v5 = vmul.f32 %v1379_v3, %v1379_v3  ;;  %v550_v7 = vmul.f32 0.03125, %v529_v4 }
 0x17c   :  { %v573_v6 = vsel %vm523_vm0, %v565_v5, 0.0  ;;  %v1388_v12 = vsub.f32 %v1311_v2, %v550_v7 }
 0x17d   :  { %v532_v8 = vpop.xlane.xlu1 %531  ;;  %574 = vadd.xlane.f32.xlu0 %v573_v6 }
 0x17e   :  { %v551_v9 = vmul.f32 0.03125, %v532_v8  ;;  %v566_v19 = vmul.f32 %v1388_v12, %v1388_v12 }
 0x180   :  { %v1385_v11 = vsub.f32 %v1315_v10, %v551_v9  ;;  %v576_v21 = vsel %vm523_vm0, %v566_v19, 0.0 }
 0x181   :  { %v535_v13 = vpop.xlane.xlu1 %534 }
 0x182   :  { %v552_v14 = vmul.f32 0.03125, %v535_v13  ;;  %v567_v58 = vmul.f32 %v1385_v11, %v1385_v11 }
 0x184   :  { %v579_v15 = vsel %vm523_vm0, %v567_v58, 0.0  ;;  %v1394_v16 = vsub.f32 %v1319_v18, %v552_v14 }
 0x185   :  { %580 = vadd.xlane.f32.xlu0 %v579_v15  ;;  %v538_v17 = vpop.xlane.xlu0 %537 }
 0x186   :  { %v553_v10 = vmul.f32 0.03125, %v538_v17  ;;  %v568_v22 = vmul.f32 %v1394_v16, %v1394_v16 }
 0x188   :  { %v1399_v20 = vsub.f32 %v1323_v26, %v553_v10  ;;  %v582_v26 = vsel %vm523_vm0, %v568_v22, 0.0 }
 0x189   :  { %v541_v2 = vpop.xlane.xlu1 %540 }
 0x18a   :  { %v554_v23 = vmul.f32 0.03125, %v541_v2  ;;  %577 = vadd.xlane.f32.xlu1 %v576_v21  ;;  %v569_v18 = vmul.f32 %v1399_v20, %v1399_v20 }
 0x18c   :  { %v1407_v24 = vsub.f32 %v1327_v34, %v554_v23  ;;  %v585_v25 = vsel %vm523_vm0, %v569_v18, 0.0  ;;  %v522_v34 = vld [vmem:[%s1529_s3 + $0x38] sm:$0xff] }
 0x18d   :  { %586 = vadd.xlane.f32.xlu0 %v585_v25  ;;  %v544_v27 = vpop.xlane.xlu0 %543  ;;  %v1423_v35 = vpop.permute.xlu1 %636 }
 0x18e   :  { %v555_v28 = vmul.f32 0.03125, %v544_v27  ;;  %583 = vadd.xlane.f32.xlu1 %v582_v26  ;;  %v570_v29 = vmul.f32 %v1407_v24, %v1407_v24 }
 0x190   :  { %v1414_v30 = vsub.f32 %v1331_v39, %v555_v28  ;;  %v588_v31 = vsel %vm523_vm0, %v570_v29, 0.0 }
 0x191   :  { %v1425_v36 = vpop.permute.xlu1 %641 }
 0x192   :  { %589 = vadd.xlane.f32.xlu1 %v588_v31  ;;  %v571_v32 = vmul.f32 %v1414_v30, %v1414_v30 }
 0x194   :  { %v591_v33 = vsel %vm523_vm0, %v571_v32, 0.0 }
 0x195   :  { %592 = vadd.xlane.f32.xlu0 %v591_v33  ;;  %v1427_v37 = vpop.permute.xlu1 %679  ;;  %v632_v54 = vpop.permute.xlu0 %631 }
 0x199   :  { %v1429_v38 = vpop.permute.xlu1 %684  ;;  %v1459_v55 = vpop.permute.xlu0 %656 }
 0x19d   :  { %v1431_v39 = vpop.permute.xlu1 %646  ;;  %v1463_v57 = vpop.permute.xlu0 %661 }
 0x1a1   :  { %v1433_v40 = vpop.permute.xlu1 %689 }
 0x1a5   :  { %v1435_v41 = vpop.permute.xlu1 %651 }
 0x1a9   :  { %v1437_v42 = vpop.permute.xlu1 %694 }
 0x1ab   :  { %714 = vperm.xlu0 %1028, %v522_v34  }
 0x1da   :  { %v547_v43 = vpop.xlane.xlu1 %546 }
 0x1db   :  { %v556_v44 = vmul.f32 0.03125, %v547_v43 }
 0x1dd   :  { %v1439_v45 = vsub.f32 %v504_v60, %v556_v44  ;;  %v1467_v60 = vpop.permute.xlu0 %666 }
 0x1de   :  { %v1461_v56 = vpop.permute.xlu1 %699 }
 0x1df   :  { %v572_v46 = vmul.f32 %v1439_v45, %v1439_v45 }
 0x1e1   :  { %v594_v47 = vsel %vm523_vm0, %v572_v46, 0.0 }
 0x1e2   :  { %595 = vadd.xlane.f32.xlu1 %v594_v47  ;;  %v1465_v59 = vpop.permute.xlu1 %704 }
 0x1f3   :  { %709 = vperm.xlu1 %1029, %v521_v48  }
 0x206   :  { %v575_v62 = vpop.xlane.xlu0 %574 }
 0x207   :  { %v597_v0 = vmul.f32 0.03125, %v575_v62 }
 0x209   :  { %v605_v6 = vadd.f32 1e-05, %v597_v0 }
 0x20e   :  { %v581_v1 = vpop.xlane.xlu0 %580 }
 0x20f   :  { %v599_v7 = vmul.f32 0.03125, %v581_v1 }
 0x211   :  { %v607_v9 = vadd.f32 1e-05, %v599_v7 }
 0x213   :  { %v578_v61 = vpop.xlane.xlu1 %577 }
 0x214   :  { %v598_v63 = vmul.f32 0.03125, %v578_v61 }
 0x216   :  { %v606_v4 = vadd.f32 1e-05, %v598_v63  ;;  %v587_v13 = vpop.xlane.xlu0 %586 }
 0x217   :  { %v584_v5 = vpop.xlane.xlu1 %583  ;;  %v601_v15 = vmul.f32 0.03125, %v587_v13 }
 0x218   :  { %1086 = vrsqrt.f32 %v606_v4  ;;  %v600_v8 = vmul.f32 0.03125, %v584_v5 }
 0x219   :  { %1088 = vrsqrt.f32 %v605_v6  ;;  %v609_v10 = vadd.f32 1e-05, %v601_v15 }
 0x21a   :  { %v608_v14 = vadd.f32 1e-05, %v600_v8  ;;  %1090 = vrsqrt.f32 %v607_v9 }
 0x21b   :  { %v590_v58 = vpop.xlane.xlu1 %589 }
 0x21c   :  { %1092 = vrsqrt.f32 %v608_v14  ;;  %v602_v17 = vmul.f32 0.03125, %v590_v58 }
 0x21d   :  { %1094 = vrsqrt.f32 %v609_v10 }
 0x21e   :  { %v593_v19 = vpop.xlane.xlu0 %592  ;;  %v610_v2 = vadd.f32 1e-05, %v602_v17  ;;  %v753_v17 = vld [vmem:[%s1530_s4 + $0x20] sm:$0xff] }
 0x21f   :  { %v603_v21 = vmul.f32 0.03125, %v593_v19 }
 0x220   :  { %1096 = vrsqrt.f32 %v610_v2  ;;  %v754_v2 = vld [vmem:[%s1530_s4 + $0x28] sm:$0xff] }
 0x221   :  { %v611_v25 = vadd.f32 1e-05, %v603_v21 }
 0x223   :  { %1098 = vrsqrt.f32 %v611_v25  ;;  %v755_v25 = vld [vmem:[%s1530_s4 + $0x30] sm:$0xff] }
 0x225   :  { %v1087_v22 = vpop.eup %1086 }
 0x226   :  { %v1089_v23 = vpop.eup %1088  ;;  %v622_v18 = vmul.f32 %v1087_v22, %v1388_v12 }
 0x227   :  { %v621_v27 = vmul.f32 %v1089_v23, %v1379_v3  ;;  %v1091_v26 = vpop.eup %1090 }
 0x228   :  { %v670_v28 = vmul.f32 %v1423_v35, %v622_v18  ;;  %v623_v32 = vmul.f32 %v1091_v26, %v1385_v11 }
 0x229   :  { %v1093_v29 = vpop.eup %1092  ;;  %v669_v31 = vmul.f32 %v632_v54, %v621_v27 }
 0x22a   :  { %v718_v33 = vadd.f32 %v1429_v38, %v670_v28  ;;  %v624_v34 = vmul.f32 %v1093_v29, %v1394_v16  ;;  %v671_v12 = vmul.f32 %v1425_v36, %v623_v32  ;;  %v1095_v44 = vpop.eup %1094  ;;  %v750_v36 = vld [vmem:[%s1530_s4 + $0x8] sm:$0xff] }
 0x22b   :  { %v717_v43 = vadd.f32 %v1427_v37, %v669_v31  ;;  %v625_v49 = vmul.f32 %v1095_v44, %v1399_v20  ;;  %v749_v20 = vld [vmem:[%s1530_s4] sm:$0xff]  ;;  %v715_v31 = vpop.permute.xlu0 %714 }
 0x22c   :  { %v734_v46 = vmul.f32 0.2, %v718_v33  ;;  %v672_v3 = vmul.f32 %v1431_v39, %v624_v34  ;;  %vm726_vm2 = vcmp.gt.f32.partialorder %v718_v33, 0.0  ;;  %v719_v48 = vadd.f32 %v1433_v40, %v671_v12 }
 0x22d   :  { %v1097_v47 = vpop.eup %1096  ;;  %v733_v35 = vmul.f32 0.2, %v717_v43  ;;  %vm725_vm3 = vcmp.gt.f32.partialorder %v717_v43, 0.0  ;;  %v673_v52 = vmul.f32 %v1435_v41, %v625_v49  ;;  %v751_v41 = vld [vmem:[%s1530_s4 + $0x10] sm:$0xff] }
 0x22e   :  { %v720_v38 = vadd.f32 %v1437_v42, %v672_v3  ;;  %v626_v16 = vmul.f32 %v1097_v47, %v1407_v24  ;;  %v742_v50 = vsel %vm726_vm2, %v718_v33, %v734_v46  ;;  %v735_v51 = vmul.f32 0.2, %v719_v48 }
 0x22f   :  { %v741_v40 = vsel %vm725_vm3, %v717_v43, %v733_v35  ;;  %v758_v54 = vmul.f32 %v750_v36, %v742_v50  ;;  %vm727_vm4 = vcmp.gt.f32.partialorder %v719_v48, 0.0  ;;  %v721_v63 = vadd.f32 %v1461_v56, %v673_v52 }
 0x230   :  { %v1099_v39 = vpop.eup %1098  ;;  %v674_v24 = vmul.f32 %v1459_v55, %v626_v16  ;;  %v736_v42 = vmul.f32 0.2, %v720_v38  ;;  %vm728_vm5 = vcmp.gt.f32.partialorder %v720_v38, 0.0  ;;  %v757_v62 = vmul.f32 %v749_v20, %v741_v40  ;;  %v752_v55 = vld [vmem:[%s1530_s4 + $0x18] sm:$0xff] }
 0x231   :  { %v627_v61 = vmul.f32 %v1099_v39, %v1414_v30  ;;  %v743_v0 = vsel %vm727_vm4, %v719_v48, %v735_v51  ;;  %v766_v1 = vsel %vm523_vm0, %v758_v54, 0.0  ;;  %v737_v9 = vmul.f32 0.2, %v721_v63 }
 0x232   :  { %v744_v5 = vsel %vm728_vm5, %v720_v38, %v736_v42  ;;  %v722_v30 = vadd.f32 %v1465_v59, %v674_v24  ;;  %v759_v7 = vmul.f32 %v751_v41, %v743_v0  ;;  %v765_v56 = vsel %vm523_vm0, %v757_v62, 0.0 }
 0x233   :  { %v675_v6 = vmul.f32 %v1463_v57, %v627_v61  ;;  %v767_v13 = vadd.f32 %v766_v1, %v765_v56  ;;  %v760_v14 = vmul.f32 %v752_v55, %v744_v5  ;;  %vm729_vm6 = vcmp.gt.f32.partialorder %v721_v63, 0.0 }
 0x234   :  { %v738_v58 = vmul.f32 0.2, %v722_v30  ;;  %vm730_vm7 = vcmp.gt.f32.partialorder %v722_v30, 0.0  ;;  %v768_v15 = vsel %vm523_vm0, %v759_v7, 0.0  ;;  %v745_v57 = vsel %vm729_vm6, %v721_v63, %v737_v9 }
 0x235   :  { %v769_v10 = vadd.f32 %v768_v15, %v767_v13  ;;  %v770_v59 = vsel %vm523_vm0, %v760_v14, 0.0  ;;  %v761_v23 = vmul.f32 %v753_v17, %v745_v57 }
 0x236   :  { %v746_v21 = vsel %vm730_vm7, %v722_v30, %v738_v58 }
 0x237   :  { %v771_v26 = vadd.f32 %v770_v59, %v769_v10  ;;  %v762_v28 = vmul.f32 %v754_v2, %v746_v21  ;;  %v772_v33 = vsel %vm523_vm0, %v761_v23, 0.0 }
 0x239   :  { %v773_v43 = vadd.f32 %v772_v33, %v771_v26  ;;  %v774_v12 = vsel %vm523_vm0, %v762_v28, 0.0 }
 0x23b   :  { %v775_v47 = vadd.f32 %v774_v12, %v773_v43 }
 0x26b   :  { %v596_v11 = vpop.xlane.xlu1 %595 }
 0x26c   :  { %v604_v37 = vmul.f32 0.03125, %v596_v11 }
 0x26e   :  { %v612_v53 = vadd.f32 1e-05, %v604_v37 }
 0x26f   :  { %v710_v4 = vpop.permute.xlu1 %709 }
 0x270   :  { %1100 = vrsqrt.f32 %v612_v53  ;;  %v723_v8 = vadd.f32 %v710_v4, %v675_v6 }
 0x272   :  { %v739_v19 = vmul.f32 0.2, %v723_v8  ;;  %vm731_vm8 = vcmp.gt.f32.partialorder %v723_v8, 0.0 }
 0x274   :  { %v747_v27 = vsel %vm731_vm8, %v723_v8, %v739_v19 }
 0x275   :  { %v763_v32 = vmul.f32 %v755_v25, %v747_v27 }
 0x277   :  { %v776_v46 = vsel %vm523_vm0, %v763_v32, 0.0 }
 0x27d   :  { %v1101_v22 = vpop.eup %1100 }
 0x27e   :  { %v628_v18 = vmul.f32 %v1101_v22, %v1439_v45  ;;  %v756_v45 = vld [vmem:[%s1530_s4 + $0x38] sm:$0xff]  ;;  %s1127_s4 = smov [#allocation2]  }
 0x27f   :  { %s871_s0 = sshll.u32 %s1127_s4, 4  ;;  %s872_s0 = int_to_ptr.vmem [resolvable:$true] %s871_s0 }
 0x280   :  { %v676_v29 = vmul.f32 %v1467_v60, %v628_v18  ;;  %v777_v60 = vadd.f32 %v776_v46, %v775_v47  ;;  %s1102_s20 = scalar_lea.vmem %s872_s0, 16  ;;  %s1106_s1 = scalar_lea.vmem %s872_s0, 32 }
 0x281   :  { %p1103_p0 = scmp.ne.s32.totalorder %s872_s0, %s1102_s20  ;;  %p1107_p1 = scmp.lt.s32.totalorder %s872_s0, %s872_s0 }
 0x282   :  { %v724_v34 = vadd.f32 %v715_v31, %v676_v29  ;;  %p1108_p2 = scmp.lt.s32.totalorder %s1106_s1, %s1102_s20 }
 0x284   :  { %vm732_vm9 = vcmp.gt.f32.partialorder %v724_v34, 0.0  ;;  %v740_v44 = vmul.f32 0.2, %v724_v34  ;;  %p1109_p3 = por %p1108_p2, %p1107_p1 }
 0x286   :  { %v748_v3 = vsel %vm732_vm9, %v724_v34, %v740_v44  ;;  %p1110_p4 = pnand %p1109_p3, %p1103_p0 }
 0x287   :  { %v764_v35 = vmul.f32 %v756_v45, %v748_v3 }
 0x289   :  { %v778_v48 = vsel %vm523_vm0, %v764_v35, 0.0 }
 0x28a   :  { %v779_v49 = vadd.f32 %v778_v48, %v777_v60 }
 0x28c   :  { %v780_v11 = vrot.slane %v779_v49, 4 }
 0x28e   :  { %v781_v38 = vadd.f32 %v780_v11, %v779_v49 }
 0x290   :  { %v782_v16 = vrot.slane %v781_v38, 2 }
 0x292   :  { %v783_v37 = vadd.f32 %v782_v16, %v781_v38 }
 0x294   :  { %v784_v50 = vrot.slane %v783_v37, 1 }
 0x296   :  { %v785_v36 = vadd.f32 %v784_v50, %v783_v37 }
 0x298   :  { %1022 = vmatmul.mubr.msk.f32.vlgmr.msra.gmra.mxu0 %vm523_vm0, %v785_v36 }
 0x358   :  { %v859_v39 = vpop.f32.mrf.mxu0 }
 0x359   :  { %864 = vst.msk [vmem:[#allocation2] sm:$0x1] %vm863_vm10, %v859_v39 }
 0x35a   :  { %v1023_v51 = vpop.f32.mrf.mxu0 }
 0x35b   :  { %1113 = shalt.err (!%p1110_p4)
}
 0x35c   :  { %874 = dma.vmem_to_hbm [thread:$0]  %s872_s0, 16, %s1532_s6, [#allocation3]  }
 0x35d   :  { %1122 = dma.done.wait [#allocation3], 16  }
 0x35e   :  { %1123 = vsyncadd [#allocation3], 4294967280 }
 0x35f   :  { %878 = vsyncpa [#allocation3], 1 }

</bundles_post_ra>
